<compile_context>
chip_gen: v7x
topology: tpu7x:2x2x1
jax: 0.10.0
libtpu: 0.0.40
codegen_flags: <defaults>
</compile_context>

<pallas_src>
import jax
import jax.numpy as jnp
from jax.experimental import pallas as pl
from jax.experimental.pallas import tpu as pltpu


def _make_tv_kernel(bc, h, w, tb):
    hw = h * w
    shift_h = w % hw if hw else 0
    shift_w = 1 % hw if hw else 0
    # With a cyclic roll, H == 2 (resp. H*W == 2) makes every vertical
    # (resp. horizontal) neighbour pair appear twice (once via the wrap).
    h_scale = 0.5 if h == 2 else 1.0
    w_scale = 0.5 if hw == 2 else 1.0

    def kernel(row_id_ref, x_ref, out_ref):
        i = pl.program_id(0)
        y = x_ref[...].astype(jnp.float32)                      # (tb, hw)
        row_id = row_id_ref[...]                                # (1, hw) int32
        flat = jax.lax.broadcasted_iota(jnp.int32, (1, hw), 1)  # lane index

        # Rows of this tile that really exist (last tile may be partial).
        rows = jax.lax.broadcasted_iota(jnp.int32, (tb, hw), 0) + i * tb
        rows_ok = rows < bc                                     # (tb, hw)

        # --- vertical neighbours: partner is `w` lanes away ----------------
        y_h = pltpu.roll(y, shift_h, axis=1)
        p_h = pltpu.roll(flat, shift_h, axis=1)
        # Direction-agnostic validity: the rolled partner must be exactly one
        # image row away (wrap pairs land h*w - w lanes away and are dropped).
        mask_h = ((flat - p_h == w) | (p_h - flat == w)) & rows_ok
        d_h = y - y_h
        h_s = jnp.sum(jnp.where(mask_h, d_h * d_h, 0.0)) * h_scale

        # --- horizontal neighbours: partner is 1 lane away, same image row --
        y_w = pltpu.roll(y, shift_w, axis=1)
        p_w = pltpu.roll(flat, shift_w, axis=1)
        r_w = pltpu.roll(row_id, shift_w, axis=1)
        mask_w = (((flat - p_w == 1) | (p_w - flat == 1))
                  & (row_id == r_w) & rows_ok)
        d_w = y - y_w
        w_s = jnp.sum(jnp.where(mask_w, d_w * d_w, 0.0)) * w_scale

        # Place the two partials into this step's own (8, 128) output block.
        r8 = jax.lax.broadcasted_iota(jnp.int32, (8, 128), 0)
        c128 = jax.lax.broadcasted_iota(jnp.int32, (8, 128), 1)
        blk = jnp.where((r8 == 0) & (c128 == 0), h_s, 0.0)
        blk = jnp.where((r8 == 0) & (c128 == 1), w_s, blk)
        out_ref[0] = blk

    return kernel


_TARGET_TILE_BYTES = 2 * 1024 * 1024  # ~2 MiB tile: amortizes the ~0.35 us
                                      # per-grid-step overhead while fitting
                                      # every generation's scoped-VMEM budget.


def l_tv_pallas(x, tv_loss_weight=1.0):
    """Pallas TPU equivalent of L_TV(TVLoss_weight).forward(x), x in NCHW."""
    b, c, h, w = x.shape
    count_h = (h - 1) * w
    count_w = h * (w - 1)
    bc = b * c
    hw = h * w

    y = x.reshape(bc, hw)  # free: contiguous reshape, keeps lanes dense (H*W)

    # Image-row index of every flattened pixel (stays resident in VMEM); lets
    # the kernel build image-boundary masks without vector div/mod.
    row_id = (jnp.arange(hw, dtype=jnp.int32) // w).reshape(1, hw)

    # Row-batched tile: biggest multiple-of-8 row count under the byte target
    # (or the whole B*C axis when it already fits).
    # TODO(synk): for very large H*W (a single row of several MiB) the pixel
    # axis should be tiled as well; not needed for typical image sizes.
    target_rows = max(8, (_TARGET_TILE_BYTES // (hw * 4)) // 8 * 8)
    tb = bc if bc <= target_rows else target_rows
    num_blocks = pl.cdiv(bc, tb)

    partials = pl.pallas_call(
        _make_tv_kernel(bc, h, w, tb),
        out_shape=jax.ShapeDtypeStruct((num_blocks, 8, 128), jnp.float32),
        grid_spec=pltpu.PrefetchScalarGridSpec(
            num_scalar_prefetch=0,
            grid=(num_blocks,),
            in_specs=[
                pl.BlockSpec((1, hw), lambda i: (0, 0)),    # row_id (resident)
                pl.BlockSpec((tb, hw), lambda i: (i, 0)),   # input tile
            ],
            out_specs=pl.BlockSpec((1, 8, 128), lambda i: (i, 0, 0)),
        ),
        compiler_params=pltpu.CompilerParams(
            dimension_semantics=("parallel",),   # no cross-step state
            vmem_limit_bytes=32 * 1024 * 1024,
        ),
    )(row_id, y)

    h_tv = jnp.sum(partials[..., 0])   # only [i, 0, 0] is non-zero
    w_tv = jnp.sum(partials[..., 1])   # only [i, 0, 1] is non-zero
    return tv_loss_weight * 2.0 * (h_tv / count_h + w_tv / count_w) / b


def _l_tv_ref(x, tv_loss_weight=1.0):
    # Pure-JAX reference matching the PyTorch module exactly.
    b, c, h, w = x.shape
    count_h = (h - 1) * w
    count_w = h * (w - 1)
    h_tv = jnp.sum((x[:, :, 1:, :] - x[:, :, : h - 1, :]) ** 2)
    w_tv = jnp.sum((x[:, :, :, 1:] - x[:, :, :, : w - 1]) ** 2)
    return tv_loss_weight * 2.0 * (h_tv / count_h + w_tv / count_w) / b


if __name__ == "__main__":
    key = jax.random.PRNGKey(0)
    B, C, H, W = 2, 4, 16, 16
    x = jax.random.normal(key, (B, C, H, W), dtype=jnp.float32)

    out = l_tv_pallas(x, tv_loss_weight=1.0)
    out = jax.block_until_ready(out)

    ref = _l_tv_ref(x, tv_loss_weight=1.0)
    assert jnp.allclose(out, ref, rtol=1e-5, atol=1e-5), (out, ref)

    print("KERNEL_OK")
</pallas_src>

<mosaic_0001>
module attributes {stable_mosaic.version = 11 : i64} {
  func.func @kernel(%arg0: i32, %arg1: memref<1x256xi32, #tpu.memory_space<vmem>>, %arg2: memref<8x256xf32, #tpu.memory_space<vmem>>, %arg3: memref<1x8x128xf32, #tpu.memory_space<vmem>>) attributes {dimension_semantics = [#tpu.dimension_semantics<parallel>], iteration_bounds = array<i64: 1>, scalar_prefetch = 0 : i64, scratch_operands = 0 : i64, tpu.core_type = #tpu.core_type<tc>, window_params = [{pipeline_mode = #tpu.pipeline_mode<synchronous>, transform_indices = @transform_0, window_bounds = array<i64: 1, 256>}, {transform_indices = @transform_1, window_bounds = array<i64: 8, 256>}, {transform_indices = @transform_2, window_bounds = array<i64: 1, 8, 128>}]} {
    %c0 = arith.constant 0 : index
    %c0_0 = arith.constant 0 : index
    %0 = vector.load %arg2[%c0, %c0_0] : memref<8x256xf32, #tpu.memory_space<vmem>>, vector<8x256xf32>
    %c0_1 = arith.constant 0 : index
    %c0_2 = arith.constant 0 : index
    %1 = vector.load %arg1[%c0_1, %c0_2] : memref<1x256xi32, #tpu.memory_space<vmem>>, vector<1x256xi32>
    %2 = tpu.iota {dimensions = array<i32: 1>} : vector<1x256xi32>
    %3 = tpu.iota {dimensions = array<i32: 0>} : vector<8x256xi32>
    %c8_i32 = arith.constant 8 : i32
    %4 = arith.muli %arg0, %c8_i32 : i32
    %5 = vector.broadcast %4 : i32 to vector<8x256xi32>
    %6 = arith.addi %3, %5 : vector<8x256xi32>
    %c8_i32_3 = arith.constant 8 : i32
    %7 = vector.broadcast %c8_i32_3 : i32 to vector<8x256xi32>
    %8 = arith.cmpi slt, %6, %7 : vector<8x256xi32>
    %c16_i32 = arith.constant 16 : i32
    %9 = tpu.dynamic_rotate %0 by %c16_i32 dim 1 : vector<8x256xf32>, i32 -> vector<8x256xf32>
    %c16_i32_4 = arith.constant 16 : i32
    %10 = tpu.dynamic_rotate %2 by %c16_i32_4 dim 1 : vector<1x256xi32>, i32 -> vector<1x256xi32>
    %11 = arith.subi %2, %10 : vector<1x256xi32>
    %c16_i32_5 = arith.constant 16 : i32
    %12 = vector.broadcast %c16_i32_5 : i32 to vector<1x256xi32>
    %13 = arith.cmpi eq, %11, %12 : vector<1x256xi32>
    %14 = arith.subi %10, %2 : vector<1x256xi32>
    %c16_i32_6 = arith.constant 16 : i32
    %15 = vector.broadcast %c16_i32_6 : i32 to vector<1x256xi32>
    %16 = arith.cmpi eq, %14, %15 : vector<1x256xi32>
    %17 = arith.ori %13, %16 : vector<1x256xi1>
    %18 = vector.broadcast %17 : vector<1x256xi1> to vector<8x256xi1>
    %19 = arith.andi %18, %8 : vector<8x256xi1>
    %20 = arith.subf %0, %9 : vector<8x256xf32>
    %21 = arith.mulf %20, %20 : vector<8x256xf32>
    %cst = arith.constant 0.000000e+00 : f32
    %22 = vector.broadcast %cst : f32 to vector<8x256xf32>
    %23 = arith.select %19, %21, %22 : vector<8x256xi1>, vector<8x256xf32>
    %24 = vector.shape_cast %23 : vector<8x256xf32> to vector<1x8x256xf32>
    %cst_7 = arith.constant dense<0.000000e+00> : vector<1xf32>
    %25 = vector.multi_reduction <add>, %24, %cst_7 [1, 2] : vector<1x8x256xf32> to vector<1xf32>
    %26 = vector.shape_cast %25 : vector<1xf32> to vector<1x1x1xf32>
    %27 = vector.extract %26[0, 0, 0] : f32 from vector<1x1x1xf32>
    %cst_8 = arith.constant 1.000000e+00 : f32
    %28 = arith.mulf %27, %cst_8 : f32
    %c1_i32 = arith.constant 1 : i32
    %29 = tpu.dynamic_rotate %0 by %c1_i32 dim 1 : vector<8x256xf32>, i32 -> vector<8x256xf32>
    %c1_i32_9 = arith.constant 1 : i32
    %30 = tpu.dynamic_rotate %2 by %c1_i32_9 dim 1 : vector<1x256xi32>, i32 -> vector<1x256xi32>
    %c1_i32_10 = arith.constant 1 : i32
    %31 = tpu.dynamic_rotate %1 by %c1_i32_10 dim 1 : vector<1x256xi32>, i32 -> vector<1x256xi32>
    %32 = arith.subi %2, %30 : vector<1x256xi32>
    %c1_i32_11 = arith.constant 1 : i32
    %33 = vector.broadcast %c1_i32_11 : i32 to vector<1x256xi32>
    %34 = arith.cmpi eq, %32, %33 : vector<1x256xi32>
    %35 = arith.subi %30, %2 : vector<1x256xi32>
    %c1_i32_12 = arith.constant 1 : i32
    %36 = vector.broadcast %c1_i32_12 : i32 to vector<1x256xi32>
    %37 = arith.cmpi eq, %35, %36 : vector<1x256xi32>
    %38 = arith.ori %34, %37 : vector<1x256xi1>
    %39 = arith.cmpi eq, %1, %31 : vector<1x256xi32>
    %40 = arith.andi %38, %39 : vector<1x256xi1>
    %41 = vector.broadcast %40 : vector<1x256xi1> to vector<8x256xi1>
    %42 = arith.andi %41, %8 : vector<8x256xi1>
    %43 = arith.subf %0, %29 : vector<8x256xf32>
    %44 = arith.mulf %43, %43 : vector<8x256xf32>
    %cst_13 = arith.constant 0.000000e+00 : f32
    %45 = vector.broadcast %cst_13 : f32 to vector<8x256xf32>
    %46 = arith.select %42, %44, %45 : vector<8x256xi1>, vector<8x256xf32>
    %47 = vector.shape_cast %46 : vector<8x256xf32> to vector<1x8x256xf32>
    %cst_14 = arith.constant dense<0.000000e+00> : vector<1xf32>
    %48 = vector.multi_reduction <add>, %47, %cst_14 [1, 2] : vector<1x8x256xf32> to vector<1xf32>
    %49 = vector.shape_cast %48 : vector<1xf32> to vector<1x1x1xf32>
    %50 = vector.extract %49[0, 0, 0] : f32 from vector<1x1x1xf32>
    %cst_15 = arith.constant 1.000000e+00 : f32
    %51 = arith.mulf %50, %cst_15 : f32
    %52 = tpu.iota {dimensions = array<i32: 0>} : vector<8x128xi32>
    %53 = tpu.iota {dimensions = array<i32: 1>} : vector<8x128xi32>
    %c0_i32 = arith.constant 0 : i32
    %54 = vector.broadcast %c0_i32 : i32 to vector<8x128xi32>
    %55 = arith.cmpi eq, %52, %54 : vector<8x128xi32>
    %c0_i32_16 = arith.constant 0 : i32
    %56 = vector.broadcast %c0_i32_16 : i32 to vector<8x128xi32>
    %57 = arith.cmpi eq, %53, %56 : vector<8x128xi32>
    %58 = arith.andi %55, %57 : vector<8x128xi1>
    %cst_17 = arith.constant 0.000000e+00 : f32
    %59 = vector.broadcast %28 : f32 to vector<8x128xf32>
    %60 = vector.broadcast %cst_17 : f32 to vector<8x128xf32>
    %61 = arith.select %58, %59, %60 : vector<8x128xi1>, vector<8x128xf32>
    %c0_i32_18 = arith.constant 0 : i32
    %62 = vector.broadcast %c0_i32_18 : i32 to vector<8x128xi32>
    %63 = arith.cmpi eq, %52, %62 : vector<8x128xi32>
    %c1_i32_19 = arith.constant 1 : i32
    %64 = vector.broadcast %c1_i32_19 : i32 to vector<8x128xi32>
    %65 = arith.cmpi eq, %53, %64 : vector<8x128xi32>
    %66 = arith.andi %63, %65 : vector<8x128xi1>
    %67 = vector.broadcast %51 : f32 to vector<8x128xf32>
    %68 = arith.select %66, %67, %61 : vector<8x128xi1>, vector<8x128xf32>
    %c0_20 = arith.constant 0 : index
    %c0_21 = arith.constant 0 : index
    %c0_22 = arith.constant 0 : index
    %69 = vector.load %arg3[%c0_20, %c0_21, %c0_22] : memref<1x8x128xf32, #tpu.memory_space<vmem>>, vector<1x8x128xf32>
    %70 = vector.shape_cast %69 : vector<1x8x128xf32> to vector<8x128xf32>
    %71 = vector.shape_cast %68 : vector<8x128xf32> to vector<1x8x128xf32>
    tpu.vector_store %arg3[%c0_20, %c0_21, %c0_22], %71 {strides = array<i32>} : memref<1x8x128xf32, #tpu.memory_space<vmem>>, vector<1x8x128xf32>,
    return
  }
  func.func @transform_0(%arg0: i32) -> (i32, i32) {
    %c0_i32 = arith.constant 0 : i32
    %c0_i32_0 = arith.constant 0 : i32
    %c0_i32_1 = arith.constant 0 : i32
    return %c0_i32, %c0_i32_0 : i32, i32
  }
  func.func @transform_1(%arg0: i32) -> (i32, i32) {
    %c0_i32 = arith.constant 0 : i32
    %c0_i32_0 = arith.constant 0 : i32
    return %arg0, %c0_i32 : i32, i32
  }
  func.func @transform_2(%arg0: i32) -> (i32, i32, i32) {
    %c0_i32 = arith.constant 0 : i32
    %c0_i32_0 = arith.constant 0 : i32
    %c0_i32_1 = arith.constant 0 : i32
    return %arg0, %c0_i32, %c0_i32_0 : i32, i32, i32
  }
}

</mosaic_0001>

<bundles_post_ra>
// kernel: tpu_custom_call.1
= control target key start
LH: loop header
LB: loop body
LE: loop exit
PB: predicated region body
PF: predicated region fallthrough
CT: control target
= control target key end

     0   :  { %7 = vsyncpa [#allocation3], 0  ;;  %s471_s0 = inlined_call_operand.hbm [shape: s32[1,256], index: 0, kind: input, shape index: {}]   ;;  %s472_s1 = inlined_call_operand.hbm [shape: f32[8,256], index: 1, kind: input, shape index: {}]   ;;  %s473_s2 = inlined_call_operand.hbm [shape: f32[1,8,128], index: 2, kind: output, shape index: {}]  }
   0x1   :  { %8 = vsyncpa [#allocation6], 0 }
   0x2   :  { %9 = vsyncpa [#allocation4], 0  ;;  %s306_s9 = smov [#allocation2]   ;;  %s307_s11 = smov [#allocation5]  }
   0x3   :  { %s16_s10 = sshll.u32 %s306_s9, 4  ;;  %s26_s12 = sshll.u32 %s307_s11, 4  ;;  %s17_s10 = int_to_ptr.vmem [resolvable:$true] %s16_s10  ;;  %s27_s12 = int_to_ptr.vmem [resolvable:$true] %s26_s12 }
   0x4   :  { %s234_s15 = scalar_lea.hbm %s471_s0, 32 }
   0x5   :  { %p235_p0 = scmp.ne.s32.totalorder %s471_s0, %s234_s15  ;;  %p238_p1 = scmp.lt.u32.totalorder %s234_s15, %s471_s0 }
   0x7   :  { %p240_p2 = pnand %p238_p1, %p235_p0 }
   0x9   :  { %243 = shalt.err (!%p240_p2)
}
   0xa   :  { %s244_s20 = scalar_lea.vmem %s17_s10, 32  ;;  %p249_p4 = scmp.lt.s32.totalorder %s17_s10, %s17_s10 }
   0xb   :  { %p245_p3 = scmp.ne.s32.totalorder %s17_s10, %s244_s20  ;;  %p250_p5 = scmp.lt.s32.totalorder %s244_s20, %s244_s20 }
   0xd   :  { %p251_p6 = por %p250_p5, %p249_p4 }
   0xf   :  { %p252_p7 = pnand %p251_p6, %p245_p3 }
  0x11   :  { %255 = shalt.err (!%p252_p7)
}
  0x12   :  { %19 = dma.hbm_to_vmem [thread:$0]  %s471_s0, 32, %s17_s10, [#allocation3]  }
  0x13   :  { %s256_s25 = scalar_lea.hbm %s472_s1, 256 }
  0x14   :  { %p257_p8 = scmp.ne.s32.totalorder %s472_s1, %s256_s25  ;;  %p260_p9 = scmp.lt.u32.totalorder %s256_s25, %s472_s1 }
  0x16   :  { %p262_p10 = pnand %p260_p9, %p257_p8 }
  0x18   :  { %265 = shalt.err (!%p262_p10)
}
  0x19   :  { %s266_s30 = scalar_lea.vmem %s27_s12, 256  ;;  %p271_p12 = scmp.lt.s32.totalorder %s27_s12, %s27_s12 }
  0x1a   :  { %p267_p11 = scmp.ne.s32.totalorder %s27_s12, %s266_s30  ;;  %p272_p13 = scmp.lt.s32.totalorder %s266_s30, %s266_s30 }
  0x1c   :  { %p273_p0 = por %p272_p13, %p271_p12 }
  0x1e   :  { %p274_p1 = pnand %p273_p0, %p267_p11 }
  0x20   :  { %277 = shalt.err (!%p274_p1)
}
  0x21   :  { %29 = dma.hbm_to_vmem [thread:$0]  %s472_s1, 256, %s27_s12, [#allocation6]  }
  0x22   :  { %300 = dma.done.wait [#allocation3], 32  }
  0x23   :  { %301 = vsyncadd [#allocation3], 4294967264 }
  0x24   :  { %302 = dma.done.wait [#allocation6], 256  }
  0x25   :  { %303 = vsyncadd [#allocation6], 4294967040  ;;  %v39_v0 = vlaneseq  ;;  %s308_s4 = smov 16   ;;  %v38_v6 = vld [vmem:[#allocation2] sm:$0x3]  ;;  %s309_s1 = smov 1  }
  0x26   :  { %v369_v9 = vld [vmem:[#allocation5 + $0x8] sm:$0xff]  ;;  %v373_v10 = vld [vmem:[#allocation5] sm:$0xff]  ;;  %v310_v12 = vmov 1966171168   ;;  %v311_v34 = vmov 0   ;;  %s312_s6 = smov [#allocation7]  }
  0x27   :  { %v352_v1 = vand.u32 127, %v39_v0  ;;  %v354_v2 = vshrl.u32 %v39_v0, 7  ;;  %v140_v13 = vunpack.c.l.s4 %v310_v12  ;;  %s213_s7 = sshll.u32 %s312_s6, 4  ;;  %s214_s7 = int_to_ptr.vmem [resolvable:$true] %s213_s7 }
  0x28   :  { %s278_s9 = scalar_lea.vmem %s214_s7, 128  ;;  %p283_p3 = scmp.lt.s32.totalorder %s214_s7, %s214_s7 }
  0x29   :  { %55 = vrot.lane.b32.xlu1 %v352_v1, %s308_s4  ;;  %v358_v3 = vadd.s32 128, %v352_v1  ;;  %v361_v4 = vsub.s32 0, %v354_v2  ;;  %v120_v5 = vsub.s32 1, %v354_v2  ;;  %vm52_vm0 = vcmp.lt.s32.totalorder %v352_v1, 16  ;;  %p279_p2 = scmp.ne.s32.totalorder %s214_s7, %s278_s9  ;;  %p284_p4 = scmp.lt.s32.totalorder %s278_s9, %s278_s9 }
  0x2a   :  { %v141_v17 = vunpack.c.0.s8 %v140_v13  ;;  %vm105_vm1 = vcmp.lt.s32.totalorder %v352_v1, 1 }
  0x2b   :  { %v117_v7 = vrot.slane %v38_v6, %v361_v4  ;;  %v121_v8 = vrot.slane %v38_v6, %v120_v5  ;;  %p285_p5 = por %p284_p4, %p283_p3 }
  0x2c   :  { %v144_v26 = vsub.s32 %v141_v17, %v354_v2 }
  0x2d   :  { %57 = vrot.lane.b32.xlu1 %v358_v3, %s308_s4  ;;  %122 = vrot.lane.b32.xlu0 %v117_v7, %s309_s1  ;;  %p286_p6 = pnand %p285_p5, %p279_p2 }
  0x31   :  { %110 = vrot.lane.b32.xlu1 %v358_v3, %s309_s1  ;;  %124 = vrot.lane.b32.xlu0 %v121_v8, %s309_s1 }
  0x35   :  { %50 = vrot.lane.b32.xlu1 %v369_v9, %s308_s4  ;;  %108 = vrot.lane.b32.xlu0 %v352_v1, %s309_s1 }
  0x39   :  { %103 = vrot.lane.b32.xlu1 %v369_v9, %s309_s1  ;;  %48 = vrot.lane.b32.xlu0 %v373_v10, %s308_s4 }
  0x3d   :  { %101 = vrot.lane.b32.xlu0 %v373_v10, %s309_s1 }
  0x9b   :  { %v56_v11 = vpop.permute.xlu1 %55 }
  0x9f   :  { %v58_v14 = vpop.permute.xlu1 %57  ;;  %v123_v22 = vpop.permute.xlu0 %122 }
  0xa0   :  { %v59_v15 = vsel %vm52_vm0, %v56_v11, %v58_v14  ;;  %v60_v16 = vsel %vm52_vm0, %v58_v14, %v56_v11 }
  0xa1   :  { %v61_v18 = vsub.s32 %v352_v1, %v60_v16  ;;  %v62_v19 = vsub.s32 %v358_v3, %v59_v15  ;;  %v65_v20 = vsub.s32 %v60_v16, %v352_v1  ;;  %v66_v21 = vsub.s32 %v59_v15, %v358_v3 }
  0xa3   :  { %vm388_vm2 = vcmp.eq.s32.totalorder %v61_v18, 16  ;;  %vm392_vm3 = vcmp.eq.s32.totalorder %v62_v19, 16  ;;  %vm67_vm4 = vcmp.eq.s32.totalorder %v65_v20, 16  ;;  %vm68_vm5 = vcmp.eq.s32.totalorder %v66_v21, 16  ;;  %v111_v25 = vpop.permute.xlu1 %110  ;;  %v125_v27 = vpop.permute.xlu0 %124 }
  0xa4   :  { %vm69_vm6 = vmor %vm388_vm2, %vm67_vm4  ;;  %v126_v28 = vsel %vm105_vm1, %v123_v22, %v125_v27  ;;  %v127_v29 = vsel %vm105_vm1, %v125_v27, %v123_v22 }
  0xa5   :  { %vm70_vm7 = vmor %vm392_vm3, %vm68_vm5  ;;  %v138_v30 = vcombine.low %v127_v29, %v126_v28  ;;  %v71_v35 = vsel %vm69_vm6, 1, %v311_v34 }
  0xa6   :  { %v72_v36 = vsel %vm70_vm7, 1, %v311_v34  ;;  %v76_v44 = vrot.slane %v71_v35, %v361_v4  ;;  %vm197_vm7 = vcmp.eq.s32.totalorder %v354_v2, 0 }
  0xa7   :  { %v145_v31 = vrot.slane %v138_v30, %v144_v26  ;;  %v109_v32 = vpop.permute.xlu0 %108  ;;  %v51_v33 = vpop.permute.xlu1 %50  ;;  %v80_v45 = vrot.slane %v72_v36, %v361_v4 }
  0xa8   :  { %v112_v37 = vsel %vm105_vm1, %v109_v32, %v111_v25  ;;  %v113_v38 = vsel %vm105_vm1, %v111_v25, %v109_v32  ;;  %vm81_vm3 = vcmp.eq.s32.totalorder %v76_v44, 1 }
  0xa9   :  { %v152_v39 = vrot.slane %v145_v31, %v144_v26  ;;  %v128_v40 = vsub.s32 %v352_v1, %v113_v38  ;;  %v129_v41 = vsub.s32 %v358_v3, %v112_v37  ;;  %v132_v42 = vsub.s32 %v113_v38, %v352_v1 }
  0xaa   :  { %v133_v43 = vsub.s32 %v112_v37, %v358_v3  ;;  %vm82_vm4 = vcmp.eq.s32.totalorder %v80_v45, 1 }
  0xab   :  { %vm153_vm8 = vcmp.eq.s32.totalorder %v38_v6, %v152_v39  ;;  %vm415_vm9 = vcmp.eq.s32.totalorder %v128_v40, 1  ;;  %vm419_vm10 = vcmp.eq.s32.totalorder %v129_v41, 1  ;;  %vm423_vm11 = vcmp.eq.s32.totalorder %v132_v42, 1  ;;  %v49_v49 = vpop.permute.xlu0 %48  ;;  %v104_v58 = vpop.permute.xlu1 %103 }
  0xac   :  { %v154_v50 = vsel %vm153_vm8, 1, %v311_v34  ;;  %vm427_vm12 = vcmp.eq.s32.totalorder %v133_v43, 1  ;;  %v53_v52 = vsel %vm52_vm0, %v49_v49, %v51_v33  ;;  %v54_v53 = vsel %vm52_vm0, %v51_v33, %v49_v49  ;;  %vm136_vm13 = vmor %vm415_vm9, %vm423_vm11 }
  0xad   :  { %v158_v54 = vrot.slane %v154_v50, %v361_v4  ;;  %v162_v55 = vrot.slane %v154_v50, %v120_v5  ;;  %v85_v56 = vsub.f32 %v373_v10, %v54_v53  ;;  %v86_v57 = vsub.f32 %v369_v9, %v53_v52  ;;  %vm137_vm0 = vmor %vm419_vm10, %vm427_vm12 }
  0xae   :  { %vm198_vm8 = vcmp.eq.s32.totalorder %v352_v1, 0  ;;  %vm202_vm9 = vcmp.eq.s32.totalorder %v352_v1, 1 }
  0xaf   :  { %vm163_vm14 = vcmp.ne.s32.totalorder %v158_v54, 0  ;;  %vm164_vm15 = vcmp.ne.s32.totalorder %v162_v55, 0  ;;  %v87_v59 = vmul.f32 %v85_v56, %v85_v56  ;;  %v88_v60 = vmul.f32 %v86_v57, %v86_v57  ;;  %v102_v61 = vpop.permute.xlu0 %101  ;;  %vm199_vm10 = vmand %vm197_vm7, %vm198_vm8 }
  0xb0   :  { %vm165_vm2 = vmand %vm136_vm13, %vm163_vm14  ;;  %v106_v62 = vsel %vm105_vm1, %v102_v61, %v104_v58  ;;  %v107_v63 = vsel %vm105_vm1, %v104_v58, %v102_v61 }
  0xb1   :  { %vm166_vm5 = vmand %vm137_vm0, %vm164_vm15  ;;  %v181_v0 = vsub.f32 %v373_v10, %v107_v63  ;;  %v182_v3 = vsub.f32 %v369_v9, %v106_v62  ;;  %v89_v5 = vsel %vm81_vm3, %v87_v59, 0.0  ;;  %v90_v6 = vsel %vm82_vm4, %v88_v60, 0.0 }
  0xb2   :  { %v91_v7 = vadd.f32 %v90_v6, %v89_v5  ;;  %v167_v8 = vsel %vm165_vm2, 1, %v311_v34  ;;  %v168_v11 = vsel %vm166_vm5, 1, %v311_v34  ;;  %vm203_vm11 = vmand %vm197_vm7, %vm202_vm9 }
  0xb3   :  { %v183_v12 = vmul.f32 %v181_v0, %v181_v0  ;;  %v184_v13 = vmul.f32 %v182_v3, %v182_v3  ;;  %v172_v14 = vrot.slane %v167_v8, %v361_v4  ;;  %v176_v15 = vrot.slane %v168_v11, %v361_v4 }
  0xb4   :  { %92 = vadd.xlane.f32.xlu0 %v91_v7 }
  0xb5   :  { %vm177_vm1 = vcmp.eq.s32.totalorder %v172_v14, 1  ;;  %vm178_vm6 = vcmp.eq.s32.totalorder %v176_v15, 1 }
  0xb6   :  { %v185_v16 = vsel %vm177_vm1, %v183_v12, 0.0  ;;  %v186_v17 = vsel %vm178_vm6, %v184_v13, 0.0 }
  0xb7   :  { %v187_v18 = vadd.f32 %v186_v17, %v185_v16 }
  0xb9   :  { %188 = vadd.xlane.f32.xlu1 %v187_v18 }
 0x141   :  { %v93_v10 = vpop.xlane.xlu0 %92 }
 0x142   :  { %v94_v9 = vrot.slane %v93_v10, 4 }
 0x144   :  { %v95_v19 = vadd.f32 %v94_v9, %v93_v10 }
 0x146   :  { %v96_v20 = vrot.slane %v95_v19, 2  ;;  %v189_v21 = vpop.xlane.xlu1 %188 }
 0x147   :  { %v190_v22 = vrot.slane %v189_v21, 4 }
 0x148   :  { %v97_v23 = vadd.f32 %v96_v20, %v95_v19 }
 0x149   :  { %v191_v24 = vadd.f32 %v190_v22, %v189_v21 }
 0x14a   :  { %v98_v25 = vrot.slane %v97_v23, 1 }
 0x14b   :  { %v192_v26 = vrot.slane %v191_v24, 2 }
 0x14c   :  { %v99_v27 = vadd.f32 %v98_v25, %v97_v23 }
 0x14d   :  { %v193_v28 = vadd.f32 %v192_v26, %v191_v24 }
 0x14e   :  { %223 = vpush %v99_v27 }
 0x14f   :  { %v194_v4 = vrot.slane %v193_v28, 1 }
 0x151   :  { %v195_v29 = vadd.f32 %v194_v4, %v193_v28 }
 0x153   :  { %225 = vpush %v195_v29 }
 0x17f   :  { %s224_s5 = spop %223 }
 0x180   :  { %v200_v30 = vstv %s224_s5 }
 0x181   :  { %v201_v31 = vsel %vm199_vm10, %v200_v30, 0.0 }
 0x184   :  { %s226_s8 = spop %225 }
 0x185   :  { %v204_v32 = vstv %s226_s8 }
 0x186   :  { %v205_v33 = vsel %vm203_vm11, %v204_v32, %v201_v31 }
 0x187   :  { %206 = vst [vmem:[#allocation7] sm:$0xff] %v205_v33 }
 0x188   :  { %289 = shalt.err (!%p286_p6)
}
 0x189   :  { %s290_s12 = scalar_lea.hbm %s473_s2, 128 }
 0x18a   :  { %p291_p7 = scmp.ne.s32.totalorder %s473_s2, %s290_s12  ;;  %p294_p8 = scmp.lt.u32.totalorder %s290_s12, %s473_s2 }
 0x18c   :  { %p296_p9 = pnand %p294_p8, %p291_p7 }
 0x18e   :  { %299 = shalt.err (!%p296_p9)
}
 0x18f   :  { %216 = dma.vmem_to_hbm [thread:$0]  %s214_s7, 128, %s473_s2, [#allocation4]  }
 0x190   :  { %304 = dma.done.wait [#allocation4], 128  }
 0x191   :  { %305 = vsyncadd [#allocation4], 4294967168 }
 0x192   :  { %220 = vsyncpa [#allocation3], 1 }
 0x193   :  { %221 = vsyncpa [#allocation6], 1 }
 0x194   :  { %222 = vsyncpa [#allocation4], 1 }

</bundles_post_ra>
